<compile_context>
chip_gen: v5e
topology: v5e:2x2
jax: 0.10.0
libtpu: 0.0.40
codegen_flags: <defaults>
</compile_context>

<pallas_src>
from typing import NamedTuple

import jax
import jax.numpy as jnp
from jax.experimental import pallas as pl
from jax.experimental.pallas import tpu as pltpu


def _round_up(x, m):
    return ((x + m - 1) // m) * m


def _cdiv(a, b):
    return -(-a // b)


def _default_compute_dtype():
    """bf16 operands on v5e (bf16-native MXU), exact f32 elsewhere."""
    try:
        kind = jax.devices()[0].device_kind.lower()
        if "v5 lite" in kind or "v5e" in kind or "v5litepod" in kind:
            return jnp.bfloat16
    except Exception:
        pass
    return jnp.float32


class PreparedDQNParams(NamedTuple):
    w1: jax.Array
    b1: jax.Array
    w2: jax.Array
    b2: jax.Array
    w3: jax.Array
    b3: jax.Array
    out_dim: int          # unpadded output width (static python int)
    compute_dtype: object


def prepare_params(params, *, compute_dtype=None):
    """One-time weight prep (hoisted out of the per-call hot path).

    - pads hidden-2 64 -> 128 (lane-dense h2; exact, zeros only),
    - pads the output dim to a multiple of 8 (narrow writeback, masked vst),
    - casts matmul operands to compute_dtype (biases stay f32).
    Call once and reuse the result across every dqn_forward call.
    """
    if compute_dtype is None:
        compute_dtype = _default_compute_dtype()

    w1, b1 = params["w1"], params["b1"]
    w2, b2 = params["w2"], params["b2"]
    w3, b3 = params["w3"], params["b3"]
    h2 = w2.shape[1]
    out_dim = w3.shape[1]

    h2_pad = _round_up(h2, 128)       # 64 -> 128: lane-dense hidden-2
    out_pad = _round_up(out_dim, 8)   # narrow output pad (NOT 128): 16x less
                                      # HBM writeback; masked vst has slack.

    if h2_pad != h2:
        w2 = jnp.pad(w2, ((0, 0), (0, h2_pad - h2)))
        b2 = jnp.pad(b2, ((0, 0), (0, h2_pad - h2)))
        w3 = jnp.pad(w3, ((0, h2_pad - h2), (0, 0)))   # zero rows -> exact
    if out_pad != out_dim:
        w3 = jnp.pad(w3, ((0, 0), (0, out_pad - out_dim)))
        b3 = jnp.pad(b3, ((0, 0), (0, out_pad - out_dim)))

    return PreparedDQNParams(
        w1=w1.astype(compute_dtype), b1=b1.astype(jnp.float32),
        w2=w2.astype(compute_dtype), b2=b2.astype(jnp.float32),
        w3=w3.astype(compute_dtype), b3=b3.astype(jnp.float32),
        out_dim=int(out_dim), compute_dtype=compute_dtype,
    )


def dqn_mlp_kernel(x_ref, w1_ref, b1_ref, w2_ref, b2_ref, w3_ref, b3_ref, o_ref):
    # Fused: Linear(in,128) -> ReLU -> Linear(128,128pad) -> ReLU ->
    #        Linear(128pad,out_pad).  Operands in compute dtype, f32 accum.
    # x is cast to the compute dtype here (saves a per-call XLA convert op).
    x = x_ref[...].astype(w1_ref.dtype)

    h1 = jnp.dot(x, w1_ref[...], preferred_element_type=jnp.float32) + b1_ref[...]
    h1 = jnp.maximum(h1, 0.0)

    h2 = jnp.dot(h1.astype(w2_ref.dtype), w2_ref[...],
                 preferred_element_type=jnp.float32) + b2_ref[...]
    h2 = jnp.maximum(h2, 0.0)

    out = jnp.dot(h2.astype(w3_ref.dtype), w3_ref[...],
                  preferred_element_type=jnp.float32) + b3_ref[...]
    o_ref[...] = out.astype(o_ref.dtype)


def _select_bm(B):
    """Batch-tile (rows per grid step) default.

    B <= 256: one grid step (lowest fixed overhead for acting batches).
    Larger:   an EVEN number of steps >= 2, capped at 2048 rows/step, so
              v7x's two TensorCores get balanced work via "parallel" semantics
              while per-step overhead stays amortized for training batches.
    """
    if B <= 256:
        return _round_up(B, 8)
    cap = 2048
    steps = max(2, _cdiv(B, cap))
    if steps % 2:
        steps += 1
    return _round_up(_cdiv(B, steps), 8)


def dqn_forward(x, prepared: PreparedDQNParams, *, bm=None):
    """x: (B, input_size) float32.  prepared: output of prepare_params()."""
    w1, b1, w2, b2, w3, b3 = (prepared.w1, prepared.b1, prepared.w2,
                              prepared.b2, prepared.w3, prepared.b3)
    B, in_dim = x.shape
    out_pad = w3.shape[1]
    out_dim = prepared.out_dim

    # Ragged batches: pad B up to a multiple of the tile (no divisibility assert).
    if bm is None:
        bm = _select_bm(B)
    bm = _round_up(bm, 8)
    Bp = _round_up(B, bm)
    if Bp != B:
        x = jnp.pad(x, ((0, Bp - B), (0, 0)))
    grid = (Bp // bm,)

    # Weights/biases are tiny; replicate fully into VMEM with constant block
    # indices (Pallas skips the re-DMA across grid steps).
    full = lambda shape: pl.BlockSpec(shape, lambda i: (0,) * len(shape))

    out_padded = pl.pallas_call(
        dqn_mlp_kernel,
        out_shape=jax.ShapeDtypeStruct((Bp, out_pad), jnp.float32),
        grid_spec=pltpu.PrefetchScalarGridSpec(
            num_scalar_prefetch=0,
            grid=grid,
            in_specs=[
                pl.BlockSpec((bm, in_dim), lambda i: (i, 0)),   # x tile
                full(w1.shape), full(b1.shape),
                full(w2.shape), full(b2.shape),
                full(w3.shape), full(b3.shape),
            ],
            out_specs=pl.BlockSpec((bm, out_pad), lambda i: (i, 0)),
        ),
        compiler_params=pltpu.CompilerParams(
            # Batch axis is independent -> shards across both TCs on v7x when
            # the grid has >= 2 steps; harmless on v5e/v6e.
            dimension_semantics=("parallel",),
        ),
    )(x, w1, b1, w2, b2, w3, b3)

    # Narrow (<=8-wide) slice; jit this function together with its downstream
    # consumer (argmax for acting, gather(action) for the TD loss) so the
    # slice fuses and adds no extra HBM pass.
    # TODO(synk): for the pure acting path, fuse the argmax into the kernel
    # (pad columns with -inf) and emit a (bm, 1) action index instead.
    return out_padded[:B, :out_dim]


def init_dqn_params(key, input_size, output_size):
    """Deterministic init matching nn.Linear's default U(-1/sqrt(fan_in), +...)."""
    dims = [(input_size, 128), (128, 64), (64, output_size)]
    params = {}
    for idx, (fan_in, fan_out) in enumerate(dims, start=1):
        key, kw, kb = jax.random.split(key, 3)
        bound = 1.0 / jnp.sqrt(jnp.float32(fan_in))
        params[f"w{idx}"] = jax.random.uniform(
            kw, (fan_in, fan_out), jnp.float32, minval=-bound, maxval=bound)
        params[f"b{idx}"] = jax.random.uniform(
            kb, (1, fan_out), jnp.float32, minval=-bound, maxval=bound)
    return params


def dqn_forward_ref(x, params):
    h1 = jnp.maximum(x @ params["w1"] + params["b1"], 0.0)
    h2 = jnp.maximum(h1 @ params["w2"] + params["b2"], 0.0)
    return h2 @ params["w3"] + params["b3"]


if __name__ == "__main__":
    key = jax.random.PRNGKey(0)
    input_size = 4     # e.g. CartPole observation dim
    output_size = 2    # e.g. CartPole action dim

    kp, kx1, kx2 = jax.random.split(key, 3)
    params = init_dqn_params(kp, input_size, output_size)

    # One-time weight prep (hoisted out of the per-call hot path).
    prep_f32 = prepare_params(params, compute_dtype=jnp.float32)
    prep_bf16 = prepare_params(params, compute_dtype=jnp.bfloat16)

    # --- Test 1: small acting batch, exact f32 path, single-step grid. ---
    batch = 8
    x = jax.random.normal(kx1, (batch, input_size), jnp.float32)
    out = jax.block_until_ready(dqn_forward(x, prep_f32))
    ref = dqn_forward_ref(x, params)
    assert out.shape == (batch, output_size)
    assert jnp.allclose(out, ref, atol=1e-5, rtol=1e-5), "f32 mismatch vs JAX reference"

    # --- Test 2: ragged training batch, f32, default even multi-step grid. ---
    batch2 = 1000
    x2 = jax.random.normal(kx2, (batch2, input_size), jnp.float32)
    out2 = jax.block_until_ready(dqn_forward(x2, prep_f32))
    ref2 = dqn_forward_ref(x2, params)
    assert out2.shape == (batch2, output_size)
    assert jnp.allclose(out2, ref2, atol=1e-5, rtol=1e-5), "f32 batch mismatch vs JAX reference"

    # --- Test 3: same batch, bf16 operands (f32 accum), explicit bm=256 (4 steps). ---
    out3 = jax.block_until_ready(dqn_forward(x2, prep_bf16, bm=256))
    assert out3.shape == (batch2, output_size)
    assert jnp.allclose(out3, ref2, atol=5e-2, rtol=5e-2), "bf16 mismatch vs JAX reference"

    print("KERNEL_OK")
</pallas_src>

<mosaic_0001>
module attributes {stable_mosaic.version = 11 : i64} {
  func.func @dqn_mlp_kernel(%arg0: i32, %arg1: memref<8x4xf32, #tpu.memory_space<vmem>>, %arg2: memref<4x128xf32, #tpu.memory_space<vmem>>, %arg3: memref<1x128xf32, #tpu.memory_space<vmem>>, %arg4: memref<128x128xf32, #tpu.memory_space<vmem>>, %arg5: memref<1x128xf32, #tpu.memory_space<vmem>>, %arg6: memref<128x8xf32, #tpu.memory_space<vmem>>, %arg7: memref<1x8xf32, #tpu.memory_space<vmem>>, %arg8: memref<8x8xf32, #tpu.memory_space<vmem>>) attributes {dimension_semantics = [#tpu.dimension_semantics<parallel>], iteration_bounds = array<i64: 1>, scalar_prefetch = 0 : i64, scratch_operands = 0 : i64, tpu.core_type = #tpu.core_type<tc>, window_params = [{transform_indices = @transform_0, window_bounds = array<i64: 8, 4>}, {pipeline_mode = #tpu.pipeline_mode<synchronous>, transform_indices = @transform_1, window_bounds = array<i64: 4, 128>}, {pipeline_mode = #tpu.pipeline_mode<synchronous>, transform_indices = @transform_2, window_bounds = array<i64: 1, 128>}, {pipeline_mode = #tpu.pipeline_mode<synchronous>, transform_indices = @transform_3, window_bounds = array<i64: 128, 128>}, {pipeline_mode = #tpu.pipeline_mode<synchronous>, transform_indices = @transform_4, window_bounds = array<i64: 1, 128>}, {pipeline_mode = #tpu.pipeline_mode<synchronous>, transform_indices = @transform_5, window_bounds = array<i64: 128, 8>}, {pipeline_mode = #tpu.pipeline_mode<synchronous>, transform_indices = @transform_6, window_bounds = array<i64: 1, 8>}, {transform_indices = @transform_7, window_bounds = array<i64: 8, 8>}]} {
    %c0 = arith.constant 0 : index
    %c0_0 = arith.constant 0 : index
    %0 = vector.load %arg1[%c0, %c0_0] : memref<8x4xf32, #tpu.memory_space<vmem>>, vector<8x4xf32>
    %c0_1 = arith.constant 0 : index
    %c0_2 = arith.constant 0 : index
    %1 = vector.load %arg2[%c0_1, %c0_2] : memref<4x128xf32, #tpu.memory_space<vmem>>, vector<4x128xf32>
    %cst = arith.constant dense<0.000000e+00> : vector<8x128xf32>
    %2 = tpu.matmul %0, %1, %cst {dimension_numbers = #tpu.dot_dimension_numbers<[1], [0], [0], [1], [0, 0, 1, 1], [], []>} : vector<8x4xf32>, vector<4x128xf32>, vector<8x128xf32> -> vector<8x128xf32>
    %c0_3 = arith.constant 0 : index
    %c0_4 = arith.constant 0 : index
    %3 = vector.load %arg3[%c0_3, %c0_4] : memref<1x128xf32, #tpu.memory_space<vmem>>, vector<1x128xf32>
    %4 = vector.broadcast %3 : vector<1x128xf32> to vector<8x128xf32>
    %5 = arith.addf %2, %4 : vector<8x128xf32>
    %cst_5 = arith.constant 0.000000e+00 : f32
    %6 = vector.broadcast %cst_5 : f32 to vector<8x128xf32>
    %7 = arith.maximumf %5, %6 : vector<8x128xf32>
    %c0_6 = arith.constant 0 : index
    %c0_7 = arith.constant 0 : index
    %8 = vector.load %arg4[%c0_6, %c0_7] : memref<128x128xf32, #tpu.memory_space<vmem>>, vector<128x128xf32>
    %cst_8 = arith.constant dense<0.000000e+00> : vector<8x128xf32>
    %9 = tpu.matmul %7, %8, %cst_8 {dimension_numbers = #tpu.dot_dimension_numbers<[1], [0], [0], [1], [0, 0, 1, 1], [], []>} : vector<8x128xf32>, vector<128x128xf32>, vector<8x128xf32> -> vector<8x128xf32>
    %c0_9 = arith.constant 0 : index
    %c0_10 = arith.constant 0 : index
    %10 = vector.load %arg5[%c0_9, %c0_10] : memref<1x128xf32, #tpu.memory_space<vmem>>, vector<1x128xf32>
    %11 = vector.broadcast %10 : vector<1x128xf32> to vector<8x128xf32>
    %12 = arith.addf %9, %11 : vector<8x128xf32>
    %cst_11 = arith.constant 0.000000e+00 : f32
    %13 = vector.broadcast %cst_11 : f32 to vector<8x128xf32>
    %14 = arith.maximumf %12, %13 : vector<8x128xf32>
    %c0_12 = arith.constant 0 : index
    %c0_13 = arith.constant 0 : index
    %15 = vector.load %arg6[%c0_12, %c0_13] : memref<128x8xf32, #tpu.memory_space<vmem>>, vector<128x8xf32>
    %cst_14 = arith.constant dense<0.000000e+00> : vector<8x8xf32>
    %16 = tpu.matmul %14, %15, %cst_14 {dimension_numbers = #tpu.dot_dimension_numbers<[1], [0], [0], [1], [0, 0, 1, 1], [], []>} : vector<8x128xf32>, vector<128x8xf32>, vector<8x8xf32> -> vector<8x8xf32>
    %c0_15 = arith.constant 0 : index
    %c0_16 = arith.constant 0 : index
    %17 = vector.load %arg7[%c0_15, %c0_16] : memref<1x8xf32, #tpu.memory_space<vmem>>, vector<1x8xf32>
    %18 = vector.broadcast %17 : vector<1x8xf32> to vector<8x8xf32>
    %19 = arith.addf %16, %18 : vector<8x8xf32>
    %c0_17 = arith.constant 0 : index
    %c0_18 = arith.constant 0 : index
    %20 = vector.load %arg8[%c0_17, %c0_18] : memref<8x8xf32, #tpu.memory_space<vmem>>, vector<8x8xf32>
    tpu.vector_store %arg8[%c0_17, %c0_18], %19 {strides = array<i32>} : memref<8x8xf32, #tpu.memory_space<vmem>>, vector<8x8xf32>,
    return
  }
  func.func @transform_0(%arg0: i32) -> (i32, i32) {
    %c0_i32 = arith.constant 0 : i32
    %c0_i32_0 = arith.constant 0 : i32
    return %arg0, %c0_i32 : i32, i32
  }
  func.func @transform_1(%arg0: i32) -> (i32, i32) {
    %c0_i32 = arith.constant 0 : i32
    %c0_i32_0 = arith.constant 0 : i32
    %c0_i32_1 = arith.constant 0 : i32
    return %c0_i32, %c0_i32_0 : i32, i32
  }
  func.func @transform_2(%arg0: i32) -> (i32, i32) {
    %c0_i32 = arith.constant 0 : i32
    %c0_i32_0 = arith.constant 0 : i32
    %c0_i32_1 = arith.constant 0 : i32
    return %c0_i32, %c0_i32_0 : i32, i32
  }
  func.func @transform_3(%arg0: i32) -> (i32, i32) {
    %c0_i32 = arith.constant 0 : i32
    %c0_i32_0 = arith.constant 0 : i32
    %c0_i32_1 = arith.constant 0 : i32
    return %c0_i32, %c0_i32_0 : i32, i32
  }
  func.func @transform_4(%arg0: i32) -> (i32, i32) {
    %c0_i32 = arith.constant 0 : i32
    %c0_i32_0 = arith.constant 0 : i32
    %c0_i32_1 = arith.constant 0 : i32
    return %c0_i32, %c0_i32_0 : i32, i32
  }
  func.func @transform_5(%arg0: i32) -> (i32, i32) {
    %c0_i32 = arith.constant 0 : i32
    %c0_i32_0 = arith.constant 0 : i32
    %c0_i32_1 = arith.constant 0 : i32
    return %c0_i32, %c0_i32_0 : i32, i32
  }
  func.func @transform_6(%arg0: i32) -> (i32, i32) {
    %c0_i32 = arith.constant 0 : i32
    %c0_i32_0 = arith.constant 0 : i32
    %c0_i32_1 = arith.constant 0 : i32
    return %c0_i32, %c0_i32_0 : i32, i32
  }
  func.func @transform_7(%arg0: i32) -> (i32, i32) {
    %c0_i32 = arith.constant 0 : i32
    %c0_i32_0 = arith.constant 0 : i32
    return %arg0, %c0_i32 : i32, i32
  }
}

</mosaic_0001>

<bundles_post_ra>
// kernel: tpu_custom_call.1
= control target key start
LH: loop header
LB: loop body
LE: loop exit
PB: predicated region body
PF: predicated region fallthrough
CT: control target
= control target key end

     0   :  { %vm37_vm0 = vcmask 1043456   ;;  %vm33_vm1 = vcmask 31744   ;;  %s348_s0 = inlined_call_operand.vmem [shape: f32[8,4], index: 0, kind: input, shape index: {}]   ;;  %s349_s1 = inlined_call_operand.vmem [shape: f32[4,128], index: 1, kind: input, shape index: {}]   ;;  %s350_s2 = inlined_call_operand.vmem [shape: f32[1,128], index: 2, kind: input, shape index: {}]   ;;  %s351_s3 = inlined_call_operand.vmem [shape: f32[128,128], index: 3, kind: input, shape index: {}]   ;;  %s352_s4 = inlined_call_operand.vmem [shape: f32[1,128], index: 4, kind: input, shape index: {}]   ;;  %s353_s5 = inlined_call_operand.vmem [shape: f32[128,8], index: 5, kind: input, shape index: {}]   ;;  %s354_s6 = inlined_call_operand.vmem [shape: f32[1,8], index: 6, kind: input, shape index: {}]   ;;  %s355_s7 = inlined_call_operand.hbm [shape: f32[8,8], index: 7, kind: output, shape index: {}]  }
   0x1   :  { %v28_v0 = vld [vmem:[%s349_s1] sm:$0xf]  ;;  %v77_v2 = vld [vmem:[%s351_s3 + $0x78] sm:$0xff]  ;;  %v76_v3 = vld [vmem:[%s351_s3 + $0x70] sm:$0xff] }
   0x2   :  { %v27_v1 = vld [vmem:[%s348_s0] sm:$0xff]  ;;  %161 = vmatpush.msk.msra.mxu0 %vm37_vm0, %v28_v0  ;;  %82 = vmatpush.msra.mxu1 %v77_v2  ;;  %v75_v4 = vld [vmem:[%s351_s3 + $0x68] sm:$0xff]  ;;  %v73_v6 = vld [vmem:[%s351_s3 + $0x58] sm:$0xff] }
   0x3   :  { %162 = vmatmul.msk.f32.vlgmr.msra.gmra.mxu0 %vm33_vm1, %v27_v1  ;;  %v74_v5 = vld [vmem:[%s351_s3 + $0x60] sm:$0xff] }
   0x4   :  { %83 = vmatpush.msra.mxu1 %v76_v3 }
   0x6   :  { %84 = vmatpush.msra.mxu1 %v75_v4 }
   0x7   :  { %12 = vsyncpa [#allocation3], 0  ;;  %v72_v7 = vld [vmem:[%s351_s3 + $0x50] sm:$0xff]  ;;  %v71_v8 = vld [vmem:[%s351_s3 + $0x48] sm:$0xff]  ;;  %s193_s20 = smov [#allocation2]   ;;  %s152_s24 = sshll.u32 %s355_s7, 4  ;;  %s153_s24 = int_to_ptr.hbm [resolvable:$true] %s152_s24 }
   0x8   :  { %85 = vmatpush.msra.mxu1 %v74_v5  ;;  %v70_v9 = vld [vmem:[%s351_s3 + $0x40] sm:$0xff]  ;;  %v69_v10 = vld [vmem:[%s351_s3 + $0x38] sm:$0xff]  ;;  %v68_v11 = vld [vmem:[%s351_s3 + $0x30] sm:$0xff]  ;;  %s150_s21 = sshll.u32 %s193_s20, 4  ;;  %vm143_vm2 = vcmask 64512   ;;  %s151_s21 = int_to_ptr.vmem [resolvable:$true] %s150_s21 }
   0x9   :  { %v67_v12 = vld [vmem:[%s351_s3 + $0x28] sm:$0xff]  ;;  %v66_v13 = vld [vmem:[%s351_s3 + $0x20] sm:$0xff]  ;;  %v65_v14 = vld [vmem:[%s351_s3 + $0x18] sm:$0xff] }
   0xa   :  { %86 = vmatpush.msra.mxu1 %v73_v6  ;;  %v64_v15 = vld [vmem:[%s351_s3 + $0x10] sm:$0xff]  ;;  %v63_v16 = vld [vmem:[%s351_s3 + $0x8] sm:$0xff]  ;;  %v62_v17 = vld [vmem:[%s351_s3] sm:$0xff] }
   0xb   :  { %v118_v18 = vld [vmem:[%s353_s5 + $0x78] sm:$0xff]  ;;  %v117_v19 = vld [vmem:[%s353_s5 + $0x70] sm:$0xff]  ;;  %v116_v20 = vld [vmem:[%s353_s5 + $0x68] sm:$0xff] }
   0xc   :  { %87 = vmatpush.msra.mxu1 %v72_v7  ;;  %123 = vmatpush.msra.mxu2 %v118_v18  ;;  %v115_v21 = vld [vmem:[%s353_s5 + $0x60] sm:$0xff]  ;;  %v114_v22 = vld [vmem:[%s353_s5 + $0x58] sm:$0xff]  ;;  %v113_v23 = vld [vmem:[%s353_s5 + $0x50] sm:$0xff] }
   0xd   :  { %v112_v24 = vld [vmem:[%s353_s5 + $0x48] sm:$0xff]  ;;  %v111_v25 = vld [vmem:[%s353_s5 + $0x40] sm:$0xff]  ;;  %v110_v26 = vld [vmem:[%s353_s5 + $0x38] sm:$0xff] }
   0xe   :  { %88 = vmatpush.msra.mxu1 %v71_v8  ;;  %124 = vmatpush.msra.mxu2 %v117_v19  ;;  %v109_v27 = vld [vmem:[%s353_s5 + $0x30] sm:$0xff]  ;;  %v108_v28 = vld [vmem:[%s353_s5 + $0x28] sm:$0xff]  ;;  %v107_v29 = vld [vmem:[%s353_s5 + $0x20] sm:$0xff] }
   0xf   :  { %v106_v30 = vld [vmem:[%s353_s5 + $0x18] sm:$0xff]  ;;  %v164_v31 = vld [vmem:[%s350_s2] ss:$0 sm:$0xff]  ;;  %v105_v35 = vld [vmem:[%s353_s5 + $0x10] sm:$0xff] }
  0x10   :  { %89 = vmatpush.msra.mxu1 %v70_v9  ;;  %125 = vmatpush.msra.mxu2 %v116_v20  ;;  %v104_v36 = vld [vmem:[%s353_s5 + $0x8] sm:$0xff]  ;;  %v103_v37 = vld [vmem:[%s353_s5] sm:$0xff] }
  0x11   :  { %v165_v38 = vld [vmem:[%s352_s4] ss:$0 sm:$0xff] }
  0x12   :  { %90 = vmatpush.msra.mxu1 %v69_v10  ;;  %126 = vmatpush.msra.mxu2 %v115_v21  ;;  %v166_v42 = vld [vmem:[%s354_s6] ss:$0 sm:$0xff] }
  0x14   :  { %91 = vmatpush.msra.mxu1 %v68_v11  ;;  %127 = vmatpush.msra.mxu2 %v114_v22 }
  0x16   :  { %92 = vmatpush.msra.mxu1 %v67_v12  ;;  %128 = vmatpush.msra.mxu2 %v113_v23 }
  0x18   :  { %93 = vmatpush.msra.mxu1 %v66_v13  ;;  %129 = vmatpush.msra.mxu2 %v112_v24 }
  0x1a   :  { %94 = vmatpush.msra.mxu1 %v65_v14  ;;  %130 = vmatpush.msra.mxu2 %v111_v25 }
  0x1c   :  { %95 = vmatpush.msra.mxu1 %v64_v15  ;;  %131 = vmatpush.msra.mxu2 %v110_v26 }
  0x1e   :  { %96 = vmatpush.msra.mxu1 %v63_v16  ;;  %132 = vmatpush.msra.mxu2 %v109_v27 }
  0x20   :  { %97 = vmatpush.msra.mxu1 %v62_v17  ;;  %133 = vmatpush.msra.mxu2 %v108_v28 }
  0x22   :  { %134 = vmatpush.msra.mxu2 %v107_v29 }
  0x24   :  { %135 = vmatpush.msra.mxu2 %v106_v30 }
  0x26   :  { %136 = vmatpush.msra.mxu2 %v105_v35 }
  0x28   :  { %137 = vmatpush.msra.mxu2 %v104_v36 }
  0x2a   :  { %138 = vmatpush.msra.mxu2 %v103_v37 }
  0x80   :  { %v58_v32 = vpop.f32.mrf.mxu0 }
  0x81   :  { %v59_v33 = vadd.f32 %v164_v31, %v58_v32 }
  0x83   :  { %v61_v34 = vmax.f32 %v59_v33, 0.0 }
  0x85   :  { %98 = vmatmul.f32.vlgmr.msra.gmra.mxu1 %v61_v34 }
 0x102   :  { %v99_v39 = vpop.f32.mrf.mxu1 }
 0x103   :  { %v100_v40 = vadd.f32 %v165_v38, %v99_v39 }
 0x105   :  { %v102_v41 = vmax.f32 %v100_v40, 0.0 }
 0x107   :  { %139 = vmatmul.f32.vlgmr.msra.gmra.mxu2 %v102_v41 }
 0x18a   :  { %v140_v43 = vpop.f32.mrf.mxu2 }
 0x18b   :  { %v141_v44 = vadd.f32 %v166_v42, %v140_v43 }
 0x18d   :  { %144 = vst.msk [vmem:[#allocation2] sm:$0xff] %vm143_vm2, %v141_v44 }
 0x18e   :  { %155 = dma.vmem_to_hbm [thread:$0]  %s151_s21, 128, %s153_s24, [#allocation3]  }
 0x18f   :  { %191 = dma.done.wait [#allocation3], 128  }
 0x190   :  { %192 = vsyncadd [#allocation3], 4294967168 }
 0x191   :  { %160 = vsyncpa [#allocation3], 1 }

</bundles_post_ra>
